<compile_context>
chip_gen: v5e
topology: v5e:2x2
jax: 0.10.0
libtpu: 0.0.40
codegen_flags: <defaults>
</compile_context>

<pallas_src>
import functools

import jax
import jax.numpy as jnp
from jax.experimental import pallas as pl
from jax.experimental.pallas import tpu as pltpu

LN_EPS = 1e-5       # torch.nn.LayerNorm default
NORM_EPS = 1e-12    # torch.nn.functional.normalize default


def autoencoder_kernel(obs_ref, p_ref, loss_ref, *, batch, obs_dim, hidden_dim):
    """Fused encoder+decoder+MSE.  All operands live at lane width H."""
    f32 = jnp.float32
    H = hidden_dim
    B = batch
    hi = jax.lax.Precision.HIGHEST

    x = obs_ref[...].astype(f32)                       # (B, H), cols >= obs_dim are zero

    # ---- static row offsets into the single packed parameter slab ----------
    w1 = p_ref[0 * H:1 * H, :]                         # (H, H) rows >= obs_dim are zero
    w2 = p_ref[1 * H:2 * H, :]                         # (H, H)
    w3 = p_ref[2 * H:3 * H, :]                         # (H, H) cols >= z_dim are zero
    d1 = p_ref[3 * H:4 * H, :]                         # (H, H) rows >= z_dim are zero
    d2 = p_ref[4 * H:5 * H, :]                         # (H, H)
    d3 = p_ref[5 * H:6 * H, :]                         # (H, H) cols >= obs_dim are zero

    vo = 6 * H                                         # 8 bias/LN rows, sublane aligned
    vecs = p_ref[vo:vo + 8, :]                         # (8, H) — one load
    # Hoist all sublane broadcasts once, off the per-layer dependency chain.
    b1  = jnp.broadcast_to(vecs[0:1, :], (B, H))
    g1  = jnp.broadcast_to(vecs[1:2, :], (B, H))
    be1 = jnp.broadcast_to(vecs[2:3, :], (B, H))
    b2  = jnp.broadcast_to(vecs[3:4, :], (B, H))
    b3  = jnp.broadcast_to(vecs[4:5, :], (B, H))
    db1 = jnp.broadcast_to(vecs[5:6, :], (B, H))
    db2 = jnp.broadcast_to(vecs[6:7, :], (B, H))
    db3 = jnp.broadcast_to(vecs[7:8, :], (B, H))

    # ---- feature_net: Linear -> LayerNorm -> tanh -> Linear -> relu -> Linear -> L2
    h = jnp.dot(x, w1, precision=hi, preferred_element_type=f32) + b1
    mu = jnp.mean(h, axis=-1, keepdims=True)
    c = h - mu
    var = jnp.mean(c * c, axis=-1, keepdims=True)
    h = c * jax.lax.rsqrt(var + LN_EPS) * g1 + be1
    h = jnp.tanh(h)

    h = jnp.dot(h, w2, precision=hi, preferred_element_type=f32) + b2
    h = jnp.maximum(h, 0.0)

    z = jnp.dot(h, w3, precision=hi, preferred_element_type=f32) + b3   # zero beyond z_dim
    ss = jnp.sum(z * z, axis=-1, keepdims=True)
    # 1 / max(||z||, eps) == rsqrt(max(||z||^2, eps^2))  -- one EUP rsqrt, no divide
    phi = z * jax.lax.rsqrt(jnp.maximum(ss, NORM_EPS * NORM_EPS))

    # ---- decoder: Linear -> relu -> Linear -> relu -> Linear
    g = jnp.dot(phi, d1, precision=hi, preferred_element_type=f32) + db1
    g = jnp.maximum(g, 0.0)
    g = jnp.dot(g, d2, precision=hi, preferred_element_type=f32) + db2
    g = jnp.maximum(g, 0.0)
    pred = jnp.dot(g, d3, precision=hi, preferred_element_type=f32) + db3

    # pred and x are both zero in the padded columns, so the squared-error SUM
    # is exact; divide by the TRUE element count (static batch*obs_dim), never
    # by the padded block shape.
    diff = pred - x
    loss_ref[0, 0] = jnp.sum(diff * diff) * (1.0 / (batch * obs_dim))


def pack_params(params, obs_dim, hidden_dim, z_dim):
    """Pack the 14 parameter tensors into ONE (6H+8, H) f32 slab.

    All matrices are stored pre-transposed as (in, out) and zero-padded to
    (H, H); bias / LN vectors are zero-padded to (1, H).  Zero padding keeps
    the padded activation columns exactly zero end-to-end.
    """
    (f_w1, f_b1, f_g1, f_be1, f_w2, f_b2, f_w3, f_b3,
     d_w1, d_b1, d_w2, d_b2, d_w3, d_b3) = params
    H = hidden_dim
    assert H >= obs_dim and H >= z_dim, "lane width = hidden_dim must dominate"
    assert H % 8 == 0, "keep weight-block row offsets sublane aligned"

    def pad_mat(a):
        return jnp.pad(a, ((0, H - a.shape[0]), (0, H - a.shape[1])))

    def pad_vec(v):
        return jnp.pad(v, ((0, 0), (0, H - v.shape[1])))

    slab = jnp.concatenate(
        [pad_mat(w) for w in (f_w1, f_w2, f_w3, d_w1, d_w2, d_w3)]
        + [pad_vec(v) for v in (f_b1, f_g1, f_be1, f_b2, f_b3, d_b1, d_b2, d_b3)],
        axis=0)
    return slab.astype(jnp.float32)


def autoencoder_loss(obs_padded, p_slab, *, batch, obs_dim, hidden_dim):
    kernel = functools.partial(
        autoencoder_kernel, batch=batch, obs_dim=obs_dim, hidden_dim=hidden_dim)
    vmem = pl.BlockSpec(memory_space=pltpu.MemorySpace.VMEM)
    out = pl.pallas_call(
        kernel,
        out_shape=jax.ShapeDtypeStruct((1, 1), jnp.float32),
        in_specs=[vmem, vmem],                                   # 2 input DMAs total
        out_specs=pl.BlockSpec(memory_space=pltpu.MemorySpace.SMEM),
    )(obs_padded, p_slab)
    return out[0, 0]


def init_params(key, obs_dim, hidden_dim, z_dim):
    ks = jax.random.split(key, 14)
    s = 0.1
    return (
        s * jax.random.normal(ks[0], (obs_dim, hidden_dim), jnp.float32),     # f_w1 (in,out)
        s * jax.random.normal(ks[1], (1, hidden_dim), jnp.float32),           # f_b1
        1.0 + s * jax.random.normal(ks[2], (1, hidden_dim), jnp.float32),     # LN gamma
        s * jax.random.normal(ks[3], (1, hidden_dim), jnp.float32),           # LN beta
        s * jax.random.normal(ks[4], (hidden_dim, hidden_dim), jnp.float32),  # f_w2
        s * jax.random.normal(ks[5], (1, hidden_dim), jnp.float32),           # f_b2
        s * jax.random.normal(ks[6], (hidden_dim, z_dim), jnp.float32),       # f_w3
        s * jax.random.normal(ks[7], (1, z_dim), jnp.float32),                # f_b3
        s * jax.random.normal(ks[8], (z_dim, hidden_dim), jnp.float32),       # d_w1
        s * jax.random.normal(ks[9], (1, hidden_dim), jnp.float32),           # d_b1
        s * jax.random.normal(ks[10], (hidden_dim, hidden_dim), jnp.float32), # d_w2
        s * jax.random.normal(ks[11], (1, hidden_dim), jnp.float32),          # d_b2
        s * jax.random.normal(ks[12], (hidden_dim, obs_dim), jnp.float32),    # d_w3
        s * jax.random.normal(ks[13], (1, obs_dim), jnp.float32),             # d_b3
    )


def reference_loss(obs, params):
    """Pure-JAX mirror of the PyTorch AutoEncoder.forward."""
    (f_w1, f_b1, f_g1, f_be1, f_w2, f_b2, f_w3, f_b3,
     d_w1, d_b1, d_w2, d_b2, d_w3, d_b3) = params
    h = obs @ f_w1 + f_b1
    mu = h.mean(-1, keepdims=True)
    var = ((h - mu) ** 2).mean(-1, keepdims=True)
    h = jnp.tanh((h - mu) / jnp.sqrt(var + LN_EPS) * f_g1 + f_be1)
    h = jnp.maximum(h @ f_w2 + f_b2, 0.0)
    z = h @ f_w3 + f_b3
    n = jnp.sqrt(jnp.sum(z * z, axis=-1, keepdims=True))
    phi = z / jnp.maximum(n, NORM_EPS)
    g = jnp.maximum(phi @ d_w1 + d_b1, 0.0)
    g = jnp.maximum(g @ d_w2 + d_b2, 0.0)
    pred = g @ d_w3 + d_b3
    return jnp.mean((pred - obs) ** 2)


if __name__ == "__main__":
    batch, obs_dim, hidden_dim, z_dim = 8, 16, 32, 8

    key = jax.random.PRNGKey(0)
    k_obs, k_par = jax.random.split(key, 2)
    obs = jax.random.normal(k_obs, (batch, obs_dim), jnp.float32)
    params = init_params(k_par, obs_dim, hidden_dim, z_dim)

    # Host-side packing: ONE parameter slab, obs zero-padded to lane width H.
    p_slab = pack_params(params, obs_dim, hidden_dim, z_dim)
    obs_padded = jnp.pad(obs, ((0, 0), (0, hidden_dim - obs_dim)))

    loss_fn = jax.jit(functools.partial(
        autoencoder_loss, batch=batch, obs_dim=obs_dim, hidden_dim=hidden_dim))
    loss = jax.block_until_ready(loss_fn(obs_padded, p_slab))

    ref = reference_loss(obs, params)
    assert jnp.isfinite(loss), loss
    assert jnp.allclose(loss, ref, atol=1e-5, rtol=1e-4), (loss, ref)

    print("KERNEL_OK")
</pallas_src>

<mosaic_0001>
module attributes {stable_mosaic.version = 11 : i64} {
  func.func @autoencoder_kernel(%arg0: memref<8x32xf32, #tpu.memory_space<vmem>>, %arg1: memref<200x32xf32, #tpu.memory_space<vmem>>, %arg2: memref<1x1xf32, #tpu.memory_space<smem>>) attributes {dimension_semantics = [], scalar_prefetch = 0 : i64, scratch_operands = 0 : i64, tpu.core_type = #tpu.core_type<tc>} {
    %c0 = arith.constant 0 : index
    %c0_0 = arith.constant 0 : index
    %0 = vector.load %arg0[%c0, %c0_0] : memref<8x32xf32, #tpu.memory_space<vmem>>, vector<8x32xf32>
    %c0_1 = arith.constant 0 : index
    %c0_2 = arith.constant 0 : index
    %1 = vector.load %arg1[%c0_1, %c0_2] : memref<200x32xf32, #tpu.memory_space<vmem>>, vector<32x32xf32>
    %c32 = arith.constant 32 : index
    %c0_3 = arith.constant 0 : index
    %2 = vector.load %arg1[%c32, %c0_3] : memref<200x32xf32, #tpu.memory_space<vmem>>, vector<32x32xf32>
    %c64 = arith.constant 64 : index
    %c0_4 = arith.constant 0 : index
    %3 = vector.load %arg1[%c64, %c0_4] : memref<200x32xf32, #tpu.memory_space<vmem>>, vector<32x32xf32>
    %c96 = arith.constant 96 : index
    %c0_5 = arith.constant 0 : index
    %4 = vector.load %arg1[%c96, %c0_5] : memref<200x32xf32, #tpu.memory_space<vmem>>, vector<32x32xf32>
    %c128 = arith.constant 128 : index
    %c0_6 = arith.constant 0 : index
    %5 = vector.load %arg1[%c128, %c0_6] : memref<200x32xf32, #tpu.memory_space<vmem>>, vector<32x32xf32>
    %c160 = arith.constant 160 : index
    %c0_7 = arith.constant 0 : index
    %6 = vector.load %arg1[%c160, %c0_7] : memref<200x32xf32, #tpu.memory_space<vmem>>, vector<32x32xf32>
    %c192 = arith.constant 192 : index
    %c0_8 = arith.constant 0 : index
    %7 = vector.load %arg1[%c192, %c0_8] : memref<200x32xf32, #tpu.memory_space<vmem>>, vector<8x32xf32>
    %8 = vector.extract_strided_slice %7 {offsets = [0, 0], sizes = [1, 32], strides = [1, 1]} : vector<8x32xf32> to vector<1x32xf32>
    %9 = vector.shape_cast %8 : vector<1x32xf32> to vector<1x32xf32>
    %10 = vector.broadcast %9 : vector<1x32xf32> to vector<8x32xf32>
    %11 = vector.extract_strided_slice %7 {offsets = [1, 0], sizes = [1, 32], strides = [1, 1]} : vector<8x32xf32> to vector<1x32xf32>
    %12 = vector.shape_cast %11 : vector<1x32xf32> to vector<1x32xf32>
    %13 = vector.broadcast %12 : vector<1x32xf32> to vector<8x32xf32>
    %14 = vector.extract_strided_slice %7 {offsets = [2, 0], sizes = [1, 32], strides = [1, 1]} : vector<8x32xf32> to vector<1x32xf32>
    %15 = vector.shape_cast %14 : vector<1x32xf32> to vector<1x32xf32>
    %16 = vector.broadcast %15 : vector<1x32xf32> to vector<8x32xf32>
    %17 = vector.extract_strided_slice %7 {offsets = [3, 0], sizes = [1, 32], strides = [1, 1]} : vector<8x32xf32> to vector<1x32xf32>
    %18 = vector.shape_cast %17 : vector<1x32xf32> to vector<1x32xf32>
    %19 = vector.broadcast %18 : vector<1x32xf32> to vector<8x32xf32>
    %20 = vector.extract_strided_slice %7 {offsets = [4, 0], sizes = [1, 32], strides = [1, 1]} : vector<8x32xf32> to vector<1x32xf32>
    %21 = vector.shape_cast %20 : vector<1x32xf32> to vector<1x32xf32>
    %22 = vector.broadcast %21 : vector<1x32xf32> to vector<8x32xf32>
    %23 = vector.extract_strided_slice %7 {offsets = [5, 0], sizes = [1, 32], strides = [1, 1]} : vector<8x32xf32> to vector<1x32xf32>
    %24 = vector.shape_cast %23 : vector<1x32xf32> to vector<1x32xf32>
    %25 = vector.broadcast %24 : vector<1x32xf32> to vector<8x32xf32>
    %26 = vector.extract_strided_slice %7 {offsets = [6, 0], sizes = [1, 32], strides = [1, 1]} : vector<8x32xf32> to vector<1x32xf32>
    %27 = vector.shape_cast %26 : vector<1x32xf32> to vector<1x32xf32>
    %28 = vector.broadcast %27 : vector<1x32xf32> to vector<8x32xf32>
    %29 = vector.extract_strided_slice %7 {offsets = [7, 0], sizes = [1, 32], strides = [1, 1]} : vector<8x32xf32> to vector<1x32xf32>
    %30 = vector.shape_cast %29 : vector<1x32xf32> to vector<1x32xf32>
    %31 = vector.broadcast %30 : vector<1x32xf32> to vector<8x32xf32>
    %cst = arith.constant dense<0.000000e+00> : vector<8x32xf32>
    %32 = tpu.matmul %0, %1, %cst {dimension_numbers = #tpu.dot_dimension_numbers<[1], [0], [0], [1], [0, 0, 1, 1], [], []>, precision = #tpu.contract_precision<fp32>} : vector<8x32xf32>, vector<32x32xf32>, vector<8x32xf32> -> vector<8x32xf32>
    %33 = arith.addf %32, %10 : vector<8x32xf32>
    %cst_9 = arith.constant dense<0.000000e+00> : vector<8xf32>
    %34 = vector.multi_reduction <add>, %33, %cst_9 [1] : vector<8x32xf32> to vector<8xf32>
    %35 = vector.shape_cast %34 : vector<8xf32> to vector<8x1xf32>
    %cst_10 = arith.constant 3.200000e+01 : f32
    %36 = vector.broadcast %cst_10 : f32 to vector<8x1xf32>
    %37 = arith.divf %35, %36 : vector<8x1xf32>
    %38 = vector.broadcast %37 : vector<8x1xf32> to vector<8x32xf32>
    %39 = arith.subf %33, %38 : vector<8x32xf32>
    %40 = arith.mulf %39, %39 : vector<8x32xf32>
    %cst_11 = arith.constant dense<0.000000e+00> : vector<8xf32>
    %41 = vector.multi_reduction <add>, %40, %cst_11 [1] : vector<8x32xf32> to vector<8xf32>
    %42 = vector.shape_cast %41 : vector<8xf32> to vector<8x1xf32>
    %cst_12 = arith.constant 3.200000e+01 : f32
    %43 = vector.broadcast %cst_12 : f32 to vector<8x1xf32>
    %44 = arith.divf %42, %43 : vector<8x1xf32>
    %cst_13 = arith.constant 9.99999974E-6 : f32
    %45 = vector.broadcast %cst_13 : f32 to vector<8x1xf32>
    %46 = arith.addf %44, %45 : vector<8x1xf32>
    %47 = math.rsqrt %46 : vector<8x1xf32>
    %48 = vector.broadcast %47 : vector<8x1xf32> to vector<8x32xf32>
    %49 = arith.mulf %39, %48 : vector<8x32xf32>
    %50 = arith.mulf %49, %13 : vector<8x32xf32>
    %51 = arith.addf %50, %16 : vector<8x32xf32>
    %52 = math.tanh %51 : vector<8x32xf32>
    %cst_14 = arith.constant dense<0.000000e+00> : vector<8x32xf32>
    %53 = tpu.matmul %52, %2, %cst_14 {dimension_numbers = #tpu.dot_dimension_numbers<[1], [0], [0], [1], [0, 0, 1, 1], [], []>, precision = #tpu.contract_precision<fp32>} : vector<8x32xf32>, vector<32x32xf32>, vector<8x32xf32> -> vector<8x32xf32>
    %54 = arith.addf %53, %19 : vector<8x32xf32>
    %cst_15 = arith.constant 0.000000e+00 : f32
    %55 = vector.broadcast %cst_15 : f32 to vector<8x32xf32>
    %56 = arith.maximumf %54, %55 : vector<8x32xf32>
    %cst_16 = arith.constant dense<0.000000e+00> : vector<8x32xf32>
    %57 = tpu.matmul %56, %3, %cst_16 {dimension_numbers = #tpu.dot_dimension_numbers<[1], [0], [0], [1], [0, 0, 1, 1], [], []>, precision = #tpu.contract_precision<fp32>} : vector<8x32xf32>, vector<32x32xf32>, vector<8x32xf32> -> vector<8x32xf32>
    %58 = arith.addf %57, %22 : vector<8x32xf32>
    %59 = arith.mulf %58, %58 : vector<8x32xf32>
    %cst_17 = arith.constant dense<0.000000e+00> : vector<8xf32>
    %60 = vector.multi_reduction <add>, %59, %cst_17 [1] : vector<8x32xf32> to vector<8xf32>
    %61 = vector.shape_cast %60 : vector<8xf32> to vector<8x1xf32>
    %cst_18 = arith.constant 1.000000e-24 : f32
    %62 = vector.broadcast %cst_18 : f32 to vector<8x1xf32>
    %63 = arith.maximumf %61, %62 : vector<8x1xf32>
    %64 = math.rsqrt %63 : vector<8x1xf32>
    %65 = vector.broadcast %64 : vector<8x1xf32> to vector<8x32xf32>
    %66 = arith.mulf %58, %65 : vector<8x32xf32>
    %cst_19 = arith.constant dense<0.000000e+00> : vector<8x32xf32>
    %67 = tpu.matmul %66, %4, %cst_19 {dimension_numbers = #tpu.dot_dimension_numbers<[1], [0], [0], [1], [0, 0, 1, 1], [], []>, precision = #tpu.contract_precision<fp32>} : vector<8x32xf32>, vector<32x32xf32>, vector<8x32xf32> -> vector<8x32xf32>
    %68 = arith.addf %67, %25 : vector<8x32xf32>
    %cst_20 = arith.constant 0.000000e+00 : f32
    %69 = vector.broadcast %cst_20 : f32 to vector<8x32xf32>
    %70 = arith.maximumf %68, %69 : vector<8x32xf32>
    %cst_21 = arith.constant dense<0.000000e+00> : vector<8x32xf32>
    %71 = tpu.matmul %70, %5, %cst_21 {dimension_numbers = #tpu.dot_dimension_numbers<[1], [0], [0], [1], [0, 0, 1, 1], [], []>, precision = #tpu.contract_precision<fp32>} : vector<8x32xf32>, vector<32x32xf32>, vector<8x32xf32> -> vector<8x32xf32>
    %72 = arith.addf %71, %28 : vector<8x32xf32>
    %cst_22 = arith.constant 0.000000e+00 : f32
    %73 = vector.broadcast %cst_22 : f32 to vector<8x32xf32>
    %74 = arith.maximumf %72, %73 : vector<8x32xf32>
    %cst_23 = arith.constant dense<0.000000e+00> : vector<8x32xf32>
    %75 = tpu.matmul %74, %6, %cst_23 {dimension_numbers = #tpu.dot_dimension_numbers<[1], [0], [0], [1], [0, 0, 1, 1], [], []>, precision = #tpu.contract_precision<fp32>} : vector<8x32xf32>, vector<32x32xf32>, vector<8x32xf32> -> vector<8x32xf32>
    %76 = arith.addf %75, %31 : vector<8x32xf32>
    %77 = arith.subf %76, %0 : vector<8x32xf32>
    %78 = arith.mulf %77, %77 : vector<8x32xf32>
    %79 = vector.shape_cast %78 : vector<8x32xf32> to vector<1x8x32xf32>
    %cst_24 = arith.constant dense<0.000000e+00> : vector<1xf32>
    %80 = vector.multi_reduction <add>, %79, %cst_24 [1, 2] : vector<1x8x32xf32> to vector<1xf32>
    %81 = vector.shape_cast %80 : vector<1xf32> to vector<1x1x1xf32>
    %82 = vector.extract %81[0, 0, 0] : f32 from vector<1x1x1xf32>
    %cst_25 = arith.constant 7.812500e-03 : f32
    %83 = arith.mulf %82, %cst_25 : f32
    %c0_26 = arith.constant 0 : index
    %c0_27 = arith.constant 0 : index
    %84 = memref.load %arg2[%c0_26, %c0_27] : memref<1x1xf32, #tpu.memory_space<smem>>
    memref.store %83, %arg2[%c0_26, %c0_27] : memref<1x1xf32, #tpu.memory_space<smem>>
    return
  }
}

</mosaic_0001>

<bundles_post_ra>
// kernel: autoencoder_loss.1
= control target key start
LH: loop header
LB: loop body
LE: loop exit
PB: predicated region body
PF: predicated region fallthrough
CT: control target
= control target key end

     0   :  { %vm46_vm0 = vcmask 261120   ;;  %s1414_s0 = inlined_call_operand.vmem [shape: f32[8,32], index: 0, kind: input, shape index: {}]   ;;  %s1415_s1 = inlined_call_operand.vmem [shape: f32[200,32], index: 1, kind: input, shape index: {}]   ;;  %s1416_s2 = inlined_call_operand.hbm [shape: f32[1,1], index: 2, kind: output, shape index: {}]  }
   0x1   :  { %v16_v0 = vld [vmem:[%s1415_s1 + $0x18] sm:$0xff]  ;;  %v15_v1 = vld [vmem:[%s1415_s1 + $0x10] sm:$0xff]  ;;  %v14_v2 = vld [vmem:[%s1415_s1 + $0x8] sm:$0xff] }
   0x2   :  { %v62_v3 = vand.u32 4294901760, %v16_v0  ;;  %v64_v4 = vand.u32 4294901760, %v15_v1  ;;  %v66_v5 = vand.u32 4294901760, %v14_v2  ;;  %v13_v6 = vld [vmem:[%s1415_s1] sm:$0xff] }
   0x3   :  { %v1314_v7 = vld [vmem:[%s1414_s0] sm:$0xff]  ;;  %v68_v8 = vand.u32 4294901760, %v13_v6 }
   0x4   :  { %v48_v9 = vsel %vm46_vm0, %v1314_v7, 0 }
   0x5   :  { %7 = vsyncpa [#allocation3], 0  ;;  %v92_v10 = vsub.f32 %v16_v0, %v62_v3  ;;  %63 = vmatpush.msra.mxu0 %v62_v3  ;;  %v98_v11 = vsub.f32 %v15_v1, %v64_v4  ;;  %163 = vmatpush.msra.mxu3 %v62_v3  ;;  %v104_v12 = vsub.f32 %v14_v2, %v66_v5  ;;  %v70_v13 = vand.u32 4294901760, %v48_v9  ;;  %v1321_v31 = vld [vmem:[%s1415_s1 + $0xc0] sm:$0xff]  ;;  %v20_v58 = vld [vmem:[%s1415_s1 + $0x38] sm:$0xff]  ;;  %s1246_s4 = sshll.u32 %s1416_s2, 4  ;;  %s1247_s4 = int_to_ptr.hbm [resolvable:$true] %s1246_s4 }
   0x6   :  { %v110_v14 = vsub.f32 %v13_v6, %v68_v8  ;;  %v38_v32 = vperm.slane %v1321_v31, 0  ;;  %v1282_v46 = vmov 32.0   ;;  %v282_v59 = vand.u32 4294901760, %v20_v58  ;;  %v19_v60 = vld [vmem:[%s1415_s1 + $0x30] sm:$0xff]  ;;  %v18_v63 = vld [vmem:[%s1415_s1 + $0x28] sm:$0xff]  ;;  %s1283_s7 = smov [#allocation2]  }
   0x7   :  { %134 = vmatpush.msra.mxu2 %v92_v10  ;;  %65 = vmatpush.msra.mxu0 %v64_v4  ;;  %v93_v15 = vand.u32 4294901760, %v92_v10  ;;  %v99_v16 = vand.u32 4294901760, %v98_v11  ;;  %v71_v17 = vsub.f32 %v48_v9, %v70_v13  ;;  %v105_v18 = vand.u32 4294901760, %v104_v12 }
   0x8   :  { %165 = vmatpush.msra.mxu3 %v64_v4  ;;  %v111_v19 = vand.u32 4294901760, %v110_v14  ;;  %1260 = vrcp.f32 %v1282_v46  ;;  %v312_v61 = vsub.f32 %v20_v58, %v282_v59  ;;  %v284_v62 = vand.u32 4294901760, %v19_v60 }
   0x9   :  { %137 = vmatpush.msra.mxu2 %v98_v11  ;;  %v94_v20 = vsub.f32 %v92_v10, %v93_v15  ;;  %67 = vmatpush.msra.mxu0 %v66_v5  ;;  %v100_v21 = vsub.f32 %v98_v11, %v99_v16  ;;  %v106_v22 = vsub.f32 %v104_v12, %v105_v18  ;;  %v72_v23 = vand.u32 4294901760, %v71_v17 }
   0xa   :  { %167 = vmatpush.msra.mxu3 %v66_v5  ;;  %v112_v27 = vsub.f32 %v110_v14, %v111_v19  ;;  %v313_v0 = vand.u32 4294901760, %v312_v61  ;;  %v318_v1 = vsub.f32 %v19_v60, %v284_v62  ;;  %v286_v2 = vand.u32 4294901760, %v18_v63 }
   0xb   :  { %v95_v24 = vand.u32 4294901760, %v94_v20  ;;  %140 = vmatpush.msra.mxu2 %v104_v12  ;;  %v101_v25 = vand.u32 4294901760, %v100_v21  ;;  %69 = vmatpush.msra.mxu0 %v68_v8  ;;  %v73_v26 = vsub.f32 %v71_v17, %v72_v23  ;;  %v107_v28 = vand.u32 4294901760, %v106_v22 }
   0xc   :  { %169 = vmatpush.msra.mxu3 %v68_v8  ;;  %v113_v30 = vand.u32 4294901760, %v112_v27  ;;  %v324_v6 = vsub.f32 %v18_v63, %v286_v2 }
   0xd   :  { %192 = vmatpush.msrb.mxu0 %v93_v15  ;;  %96 = vmatpush.msra.mxu1 %v95_v24  ;;  %v74_v29 = vand.u32 4294901760, %v73_v26 }
   0xe   :  { %143 = vmatpush.msra.mxu2 %v110_v14  ;;  %173 = vmatmul.f32.vlgmr.msra.gmra.mxu3 %v72_v23  ;;  %v1261_v47 = vpop.eup %1260  ;;  %v325_v11 = vand.u32 4294901760, %v324_v6 }
   0xf   :  { %146 = vmatmul.f32.vlgmr.msra.gmra.mxu2 %v71_v17  ;;  %102 = vmatpush.msra.mxu1 %v101_v25  ;;  %v239_v48 = vmul.f32 32.0, %v1261_v47  ;;  %vm243_vm1 = vweird.f32 %v1261_v47 }
  0x10   :  { %75 = vmatmul.f32.vlgmr.msra.gmra.mxu0 %v74_v29  ;;  %283 = vmatpush.msrb.mxu2 %v282_v59  ;;  %v326_v15 = vsub.f32 %v324_v6, %v325_v11 }
  0x11   :  { %196 = vmatpush.msrb.mxu0 %v99_v16  ;;  %108 = vmatpush.msra.mxu1 %v107_v28  ;;  %v240_v49 = vsub.f32 1.0, %v239_v48  ;;  %v39_v28 = vperm.slane %v1321_v31, 1 }
  0x12   :  { %285 = vmatpush.msrb.mxu2 %v284_v62 }
  0x13   :  { %200 = vmatpush.msrb.mxu0 %v105_v18  ;;  %114 = vmatpush.msra.mxu1 %v113_v30  ;;  %v241_v50 = vmul.f32 %v1261_v47, %v240_v49  ;;  %v327_v18 = vand.u32 4294901760, %v326_v15  ;;  %v40_v30 = vperm.slane %v1321_v31, 2 }
  0x14   :  { %116 = vmatmul.f32.vlgmr.msra.gmra.mxu1 %v70_v13  ;;  %287 = vmatpush.msrb.mxu2 %v286_v2 }
  0x15   :  { %204 = vmatpush.msrb.mxu0 %v111_v19  ;;  %223 = vmatpush.msrb.mxu1 %v62_v3  ;;  %v242_v51 = vadd.f32 %v1261_v47, %v241_v50  ;;  %v17_v3 = vld [vmem:[%s1415_s1 + $0x20] sm:$0xff] }
  0x17   :  { %225 = vmatpush.msrb.mxu1 %v64_v4  ;;  %v244_v52 = vsel %vm243_vm1, %v1261_v47, %v242_v51  ;;  %354 = vmatpush.msra.mxu0 %v312_v61  ;;  %v314_v4 = vsub.f32 %v312_v61, %v313_v0  ;;  %v22_v47 = vld [vmem:[%s1415_s1 + $0x48] sm:$0xff]  ;;  %v21_v51 = vld [vmem:[%s1415_s1 + $0x40] sm:$0xff] }
  0x18   :  { %206 = vmatmul.f32.vlgmr.msrb.gmra.mxu0 %v70_v13  ;;  %v475_v50 = vand.u32 4294901760, %v22_v47 }
  0x19   :  { %227 = vmatpush.msrb.mxu1 %v66_v5  ;;  %v319_v5 = vand.u32 4294901760, %v318_v1  ;;  %357 = vmatpush.msra.mxu0 %v318_v1  ;;  %v315_v9 = vand.u32 4294901760, %v314_v4 }
  0x1b   :  { %229 = vmatpush.msrb.mxu1 %v68_v8  ;;  %v288_v8 = vand.u32 4294901760, %v17_v3  ;;  %v320_v10 = vsub.f32 %v318_v1, %v319_v5  ;;  %360 = vmatpush.msra.mxu0 %v324_v6 }
  0x1c   :  { %231 = vmatmul.f32.vlgmr.msrb.gmra.mxu1 %v70_v13  ;;  %316 = vmatpush.msrb.mxu3 %v315_v9 }
  0x1d   :  { %383 = vmatpush.msra.mxu1 %v282_v59  ;;  %v330_v12 = vsub.f32 %v17_v3, %v288_v8  ;;  %289 = vmatpush.msrb.mxu2 %v288_v8  ;;  %v321_v14 = vand.u32 4294901760, %v320_v10 }
  0x1f   :  { %385 = vmatpush.msra.mxu1 %v284_v62  ;;  %v331_v16 = vand.u32 4294901760, %v330_v12  ;;  %363 = vmatpush.msra.mxu0 %v330_v12 }
  0x20   :  { %412 = vmatpush.msra.mxu2 %v313_v0  ;;  %322 = vmatpush.msrb.mxu3 %v321_v14 }
  0x21   :  { %387 = vmatpush.msra.mxu1 %v286_v2  ;;  %v332_v19 = vsub.f32 %v330_v12, %v331_v16 }
  0x22   :  { %416 = vmatpush.msra.mxu2 %v319_v5  ;;  %328 = vmatpush.msrb.mxu3 %v327_v18 }
  0x23   :  { %389 = vmatpush.msra.mxu1 %v288_v8  ;;  %v333_v21 = vand.u32 4294901760, %v332_v19 }
  0x24   :  { %420 = vmatpush.msra.mxu2 %v325_v11 }
  0x25   :  { %334 = vmatpush.msrb.mxu3 %v333_v21 }
  0x26   :  { %424 = vmatpush.msra.mxu2 %v331_v16 }
  0x27   :  { %443 = vmatpush.msra.mxu3 %v282_v59 }
  0x29   :  { %445 = vmatpush.msra.mxu3 %v284_v62 }
  0x2b   :  { %447 = vmatpush.msra.mxu3 %v286_v2  ;;  %v41_v2 = vperm.slane %v1321_v31, 3 }
  0x2d   :  { %449 = vmatpush.msra.mxu3 %v288_v8 }
  0x8d   :  { %v76_v33 = vpop.f32.mrf.mxu0 }
  0x8e   :  { %v77_v34 = vadd.f32 %v76_v33, %v38_v32 }
  0x91   :  { %v117_v35 = vpop.f32.mrf.mxu1  ;;  %v174_v38 = vpop.f32.mrf.mxu3 }
  0x92   :  { %v147_v36 = vpop.f32.mrf.mxu2  ;;  %v118_v37 = vadd.f32 %v117_v35, %v77_v34 }
  0x94   :  { %v148_v39 = vadd.f32 %v147_v36, %v118_v37 }
  0x95   :  { %v207_v40 = vpop.f32.mrf.mxu0 }
  0x96   :  { %v175_v41 = vadd.f32 %v174_v38, %v148_v39 }
  0x98   :  { %v208_v42 = vadd.f32 %v207_v40, %v175_v41 }
  0x99   :  { %v232_v43 = vpop.f32.mrf.mxu1 }
  0x9a   :  { %v233_v44 = vadd.f32 %v232_v43, %v208_v42  ;;  %v24_v42 = vld [vmem:[%s1415_s1 + $0x58] sm:$0xff] }
  0x9b   :  { %v471_v43 = vand.u32 4294901760, %v24_v42 }
  0x9c   :  { %v235_v45 = vsel %vm46_vm0, %v233_v44, 0.0 }
  0x9d   :  { %236 = vadd.xlane.f32.xlu0 %v235_v45  ;;  %v501_v45 = vsub.f32 %v24_v42, %v471_v43  ;;  %472 = vmatpush.msrb.mxu0 %v471_v43 }
  0x9f   :  { %v502_v48 = vand.u32 4294901760, %v501_v45 }
 0x110   :  { %v237_v53 = vpop.xlane.xlu0 %236 }
 0x111   :  { %v245_v54 = vmul.f32 %v244_v52, %v237_v53 }
 0x113   :  { %v1325_v55 = vsub.f32 %v233_v44, %v245_v54  ;;  %v23_v44 = vld [vmem:[%s1415_s1 + $0x50] sm:$0xff]  ;;  %v513_v54 = vsub.f32 %v22_v47, %v475_v50 }
 0x114   :  { %v473_v46 = vand.u32 4294901760, %v23_v44 }
 0x115   :  { %v247_v56 = vmul.f32 %v1325_v55, %v1325_v55  ;;  %v514_v58 = vand.u32 4294901760, %v513_v54 }
 0x116   :  { %v507_v49 = vsub.f32 %v23_v44, %v473_v46  ;;  %474 = vmatpush.msrb.mxu0 %v473_v46  ;;  %v26_v44 = vld [vmem:[%s1415_s1 + $0x68] sm:$0xff] }
 0x117   :  { %v248_v57 = vsel %vm46_vm0, %v247_v56, 0.0  ;;  %v515_v61 = vsub.f32 %v513_v54, %v514_v58  ;;  %v679_v47 = vand.u32 4294901760, %v26_v44 }
 0x118   :  { %249 = vadd.xlane.f32.xlu0 %v248_v57  ;;  %v508_v53 = vand.u32 4294901760, %v507_v49  ;;  %476 = vmatpush.msrb.mxu0 %v475_v50 }
 0x119   :  { %v516_v63 = vand.u32 4294901760, %v515_v61 }
 0x11a   :  { %v509_v57 = vsub.f32 %v507_v49, %v508_v53 }
 0x11c   :  { %v510_v60 = vand.u32 4294901760, %v509_v57 }
 0x18b   :  { %v250_v13 = vpop.xlane.xlu0 %249 }
 0x18c   :  { %v251_v17 = vmul.f32 %v250_v13, %v244_v52  ;;  %v503_v52 = vsub.f32 %v501_v45, %v502_v48 }
 0x18e   :  { %v252_v20 = vadd.f32 1e-05, %v251_v17  ;;  %v504_v56 = vand.u32 4294901760, %v503_v52 }
 0x190   :  { %1262 = vrsqrt.f32 %v252_v20  ;;  %vm259_vm3 = vweird.f32 %v252_v20  ;;  %505 = vmatpush.msrb.mxu1 %v504_v56 }
 0x192   :  { %511 = vmatpush.msrb.mxu1 %v510_v60 }
 0x194   :  { %517 = vmatpush.msrb.mxu1 %v516_v63 }
 0x196   :  { %v1263_v22 = vpop.eup %1262 }
 0x197   :  { %v254_v23 = vmul.f32 %v1263_v22, %v252_v20  ;;  %vm260_vm2 = vweird.f32 %v1263_v22 }
 0x198   :  { %vm261_vm4 = vmor %vm259_vm3, %vm260_vm2 }
 0x199   :  { %v255_v24 = vmul.f32 %v1263_v22, %v254_v23  ;;  %v42_v23 = vperm.slane %v1321_v31, 4 }
 0x19b   :  { %v256_v25 = vmul.f32 0.5, %v255_v24 }
 0x19d   :  { %v257_v26 = vsub.f32 1.5, %v256_v25 }
 0x19f   :  { %v258_v27 = vmul.f32 %v1263_v22, %v257_v26 }
 0x1a1   :  { %v262_v29 = vsel %vm261_vm4, %v1263_v22, %v258_v27 }
 0x1a2   :  { %v263_v32 = vmul.f32 %v262_v29, %v1325_v55  ;;  %v477_v55 = vand.u32 4294901760, %v21_v51 }
 0x1a4   :  { %v264_v33 = vmul.f32 %v263_v32, %v39_v28  ;;  %v519_v59 = vsub.f32 %v21_v51, %v477_v55  ;;  %478 = vmatpush.msrb.mxu0 %v477_v55  ;;  %v717_v51 = vsub.f32 %v26_v44, %v679_v47 }
 0x1a6   :  { %v265_v34 = vadd.f32 %v264_v33, %v40_v30  ;;  %v520_v62 = vand.u32 4294901760, %v519_v59 }
 0x1a8   :  { %1264 = vtanh.f32 %v265_v34  ;;  %v521_v0 = vsub.f32 %v519_v59, %v520_v62 }
 0x1aa   :  { %v522_v1 = vand.u32 4294901760, %v521_v0 }
 0x1ac   :  { %523 = vmatpush.msrb.mxu1 %v522_v1 }
 0x1ae   :  { %v1265_v35 = vpop.eup %1264 }
 0x1af   :  { %v268_v36 = vsel %vm46_vm0, %v1265_v35, 0 }
 0x1b0   :  { %v290_v37 = vand.u32 4294901760, %v268_v36 }
 0x1b2   :  { %336 = vmatmul.f32.vlgmr.msrb.gmra.mxu3 %v290_v37  ;;  %v291_v38 = vsub.f32 %v268_v36, %v290_v37 }
 0x1b3   :  { %572 = vmatpush.msrb.mxu3 %v471_v43 }
 0x1b4   :  { %366 = vmatmul.f32.vlgmr.msra.gmra.mxu0 %v291_v38  ;;  %v292_v39 = vand.u32 4294901760, %v291_v38 }
 0x1b5   :  { %574 = vmatpush.msrb.mxu3 %v473_v46  ;;  %601 = vmatpush.msra.mxu0 %v502_v48  ;;  %v25_v48 = vld [vmem:[%s1415_s1 + $0x60] sm:$0xff] }
 0x1b6   :  { %393 = vmatmul.f32.vlgmr.msra.gmra.mxu1 %v292_v39  ;;  %v293_v40 = vsub.f32 %v291_v38, %v292_v39  ;;  %v28_v39 = vld [vmem:[%s1415_s1 + $0x78] sm:$0xff]  ;;  %v681_v52 = vand.u32 4294901760, %v25_v48 }
 0x1b7   :  { %576 = vmatpush.msrb.mxu3 %v475_v50  ;;  %605 = vmatpush.msra.mxu0 %v508_v53 }
 0x1b8   :  { %v294_v41 = vand.u32 4294901760, %v293_v40  ;;  %632 = vmatpush.msra.mxu1 %v471_v43  ;;  %v675_v40 = vand.u32 4294901760, %v28_v39  ;;  %v723_v56 = vsub.f32 %v25_v48, %v681_v52 }
 0x1b9   :  { %578 = vmatpush.msrb.mxu3 %v477_v55  ;;  %609 = vmatpush.msra.mxu0 %v514_v58 }
 0x1ba   :  { %295 = vmatmul.f32.vlgmr.msrb.gmra.mxu2 %v294_v41  ;;  %451 = vmatmul.f32.vlgmr.msra.gmra.mxu3 %v290_v37  ;;  %v27_v41 = vld [vmem:[%s1415_s1 + $0x70] sm:$0xff]  ;;  %v705_v42 = vsub.f32 %v28_v39, %v675_v40 }
 0x1bb   :  { %543 = vmatpush.msrb.mxu2 %v501_v45  ;;  %613 = vmatpush.msra.mxu0 %v520_v62  ;;  %v677_v43 = vand.u32 4294901760, %v27_v41 }
 0x1bc   :  { %634 = vmatpush.msra.mxu1 %v473_v46  ;;  %v706_v45 = vand.u32 4294901760, %v705_v42 }
 0x1bd   :  { %546 = vmatpush.msrb.mxu2 %v507_v49  ;;  %v711_v46 = vsub.f32 %v27_v41, %v677_v43  ;;  %v43_v41 = vperm.slane %v1321_v31, 5 }
 0x1be   :  { %636 = vmatpush.msra.mxu1 %v475_v50  ;;  %v707_v49 = vsub.f32 %v705_v42, %v706_v45 }
 0x1bf   :  { %549 = vmatpush.msrb.mxu2 %v513_v54  ;;  %v712_v50 = vand.u32 4294901760, %v711_v46 }
 0x1c0   :  { %638 = vmatpush.msra.mxu1 %v477_v55  ;;  %v708_v53 = vand.u32 4294901760, %v707_v49  ;;  %v718_v55 = vand.u32 4294901760, %v717_v51 }
 0x1c1   :  { %552 = vmatpush.msrb.mxu2 %v519_v59  ;;  %v713_v54 = vsub.f32 %v711_v46, %v712_v50  ;;  %v724_v59 = vand.u32 4294901760, %v723_v56 }
 0x1c2   :  { %426 = vmatmul.f32.vlgmr.msra.gmra.mxu2 %v290_v37  ;;  %709 = vmatpush.msra.mxu3 %v708_v53  ;;  %v719_v58 = vsub.f32 %v717_v51, %v718_v55 }
 0x1c3   :  { %676 = vmatpush.msra.mxu2 %v675_v40  ;;  %v714_v57 = vand.u32 4294901760, %v713_v54  ;;  %v725_v61 = vsub.f32 %v723_v56, %v724_v59 }
 0x1c4   :  { %v720_v60 = vand.u32 4294901760, %v719_v58 }
 0x1c5   :  { %678 = vmatpush.msra.mxu2 %v677_v43  ;;  %715 = vmatpush.msra.mxu3 %v714_v57  ;;  %v726_v62 = vand.u32 4294901760, %v725_v61  ;;  %v36_v61 = vld [vmem:[%s1415_s1 + $0xb8] sm:$0xff] }
 0x1c7   :  { %680 = vmatpush.msra.mxu2 %v679_v47  ;;  %721 = vmatpush.msra.mxu3 %v720_v60 }
 0x1c9   :  { %682 = vmatpush.msra.mxu2 %v681_v52  ;;  %727 = vmatpush.msra.mxu3 %v726_v62  ;;  %v1053_v62 = vand.u32 4294901760, %v36_v61 }
 0x231   :  { %v367_v8 = vpop.f32.mrf.mxu0 }
 0x233   :  { %v394_v10 = vpop.f32.mrf.mxu1 }
 0x235   :  { %v337_v3 = vpop.f32.mrf.mxu3 }
 0x23d   :  { %v296_v4 = vpop.f32.mrf.mxu2  ;;  %v452_v14 = vpop.f32.mrf.mxu3 }
 0x23e   :  { %v297_v5 = vadd.f32 %v296_v4, %v41_v2 }
 0x240   :  { %v338_v6 = vadd.f32 %v337_v3, %v297_v5 }
 0x242   :  { %v368_v9 = vadd.f32 %v367_v8, %v338_v6 }
 0x244   :  { %v395_v11 = vadd.f32 %v394_v10, %v368_v9 }
 0x245   :  { %v427_v12 = vpop.f32.mrf.mxu2 }
 0x246   :  { %v428_v13 = vadd.f32 %v427_v12, %v395_v11 }
 0x248   :  { %v453_v15 = vadd.f32 %v452_v14, %v428_v13 }
 0x24a   :  { %v455_v16 = vmax.f32 %v453_v15, 0.0 }
 0x24c   :  { %v457_v17 = vsel %vm46_vm0, %v455_v16, 0  ;;  %v32_v16 = vld [vmem:[%s1415_s1 + $0x98] sm:$0xff] }
 0x24d   :  { %v479_v18 = vand.u32 4294901760, %v457_v17 }
 0x24f   :  { %v480_v19 = vsub.f32 %v457_v17, %v479_v18  ;;  %525 = vmatmul.f32.vlgmr.msrb.gmra.mxu1 %v479_v18  ;;  %v864_v17 = vand.u32 4294901760, %v32_v16 }
 0x250   :  { %776 = vmatpush.msrb.mxu1 %v675_v40 }
 0x251   :  { %555 = vmatmul.f32.vlgmr.msrb.gmra.mxu2 %v480_v19  ;;  %v481_v20 = vand.u32 4294901760, %v480_v19 }
 0x252   :  { %778 = vmatpush.msrb.mxu1 %v677_v43  ;;  %805 = vmatpush.msrb.mxu2 %v706_v45 }
 0x253   :  { %582 = vmatmul.f32.vlgmr.msrb.gmra.mxu3 %v481_v20  ;;  %v482_v21 = vsub.f32 %v480_v19, %v481_v20  ;;  %v894_v19 = vsub.f32 %v32_v16, %v864_v17 }
 0x254   :  { %780 = vmatpush.msrb.mxu1 %v679_v47  ;;  %809 = vmatpush.msrb.mxu2 %v712_v50 }
 0x255   :  { %v483_v22 = vand.u32 4294901760, %v482_v21  ;;  %836 = vmatpush.msrb.mxu3 %v675_v40  ;;  %v30_v21 = vld [vmem:[%s1415_s1 + $0x88] sm:$0xff] }
 0x256   :  { %782 = vmatpush.msrb.mxu1 %v681_v52  ;;  %813 = vmatpush.msrb.mxu2 %v718_v55 }
 0x257   :  { %484 = vmatmul.f32.vlgmr.msrb.gmra.mxu0 %v483_v22  ;;  %640 = vmatmul.f32.vlgmr.msra.gmra.mxu1 %v479_v18  ;;  %v895_v22 = vand.u32 4294901760, %v894_v19 }
 0x258   :  { %747 = vmatpush.msrb.mxu0 %v705_v42  ;;  %817 = vmatpush.msrb.mxu2 %v724_v59 }
 0x259   :  { %838 = vmatpush.msrb.mxu3 %v677_v43 }
 0x25a   :  { %750 = vmatpush.msrb.mxu0 %v711_v46 }
 0x25b   :  { %840 = vmatpush.msrb.mxu3 %v679_v47 }
 0x25c   :  { %753 = vmatpush.msrb.mxu0 %v717_v51 }
 0x25d   :  { %842 = vmatpush.msrb.mxu3 %v681_v52 }
 0x25e   :  { %756 = vmatpush.msrb.mxu0 %v723_v56 }
 0x25f   :  { %615 = vmatmul.f32.vlgmr.msra.gmra.mxu0 %v479_v18  ;;  %v31_v18 = vld [vmem:[%s1415_s1 + $0x90] sm:$0xff] }
 0x260   :  { %v866_v20 = vand.u32 4294901760, %v31_v18  ;;  %865 = vmatpush.msra.mxu0 %v864_v17 }
 0x262   :  { %867 = vmatpush.msra.mxu0 %v866_v20 }
 0x2cc   :  { %v526_v24 = vpop.f32.mrf.mxu1 }
 0x2d4   :  { %v485_v25 = vpop.f32.mrf.mxu0  ;;  %v556_v28 = vpop.f32.mrf.mxu2 }
 0x2d5   :  { %v486_v26 = vadd.f32 %v485_v25, %v42_v23  ;;  %v641_v35 = vpop.f32.mrf.mxu1  ;;  %v900_v23 = vsub.f32 %v31_v18, %v866_v20  ;;  %v29_v25 = vld [vmem:[%s1415_s1 + $0x80] sm:$0xff] }
 0x2d6   :  { %v583_v30 = vpop.f32.mrf.mxu3 }
 0x2d7   :  { %v527_v27 = vadd.f32 %v526_v24, %v486_v26  ;;  %v868_v24 = vand.u32 4294901760, %v30_v21  ;;  %v896_v26 = vsub.f32 %v894_v19, %v895_v22 }
 0x2d9   :  { %v557_v29 = vadd.f32 %v556_v28, %v527_v27  ;;  %v901_v27 = vand.u32 4294901760, %v900_v23  ;;  %v906_v28 = vsub.f32 %v30_v21, %v868_v24  ;;  %869 = vmatpush.msra.mxu0 %v868_v24 }
 0x2db   :  { %v584_v32 = vadd.f32 %v583_v30, %v557_v29  ;;  %v870_v29 = vand.u32 4294901760, %v29_v25  ;;  %v897_v30 = vand.u32 4294901760, %v896_v26 }
 0x2dc   :  { %v616_v33 = vpop.f32.mrf.mxu0 }
 0x2dd   :  { %v617_v34 = vadd.f32 %v616_v33, %v584_v32  ;;  %v902_v32 = vsub.f32 %v900_v23, %v901_v27  ;;  %v907_v33 = vand.u32 4294901760, %v906_v28  ;;  %871 = vmatpush.msra.mxu0 %v870_v29  ;;  %898 = vmatpush.msra.mxu1 %v897_v30 }
 0x2df   :  { %v1361_v36 = vadd.f32 %v641_v35, %v617_v34  ;;  %v912_v34 = vsub.f32 %v29_v25, %v870_v29  ;;  %v903_v35 = vand.u32 4294901760, %v902_v32 }
 0x2e1   :  { %v644_v37 = vmul.f32 %v1361_v36, %v1361_v36  ;;  %904 = vmatpush.msra.mxu1 %v903_v35 }
 0x2e3   :  { %v645_v38 = vsel %vm46_vm0, %v644_v37, 0.0  ;;  %v913_v37 = vand.u32 4294901760, %v912_v34 }
 0x2e4   :  { %646 = vadd.xlane.f32.xlu1 %v645_v38 }
 0x2e5   :  { %v914_v39 = vsub.f32 %v912_v34, %v913_v37 }
 0x2e7   :  { %v915_v40 = vand.u32 4294901760, %v914_v39 }
 0x357   :  { %v647_v63 = vpop.xlane.xlu1 %646 }
 0x358   :  { %v648_v0 = vmax.f32 %v647_v63, 1e-24  ;;  %v35_v63 = vld [vmem:[%s1415_s1 + $0xb0] sm:$0xff] }
 0x35a   :  { %1266 = vrsqrt.f32 %v648_v0  ;;  %vm655_vm6 = vweird.f32 %v648_v0 }
 0x360   :  { %v1267_v1 = vpop.eup %1266 }
 0x361   :  { %v650_v2 = vmul.f32 %v1267_v1, %v648_v0  ;;  %vm656_vm5 = vweird.f32 %v1267_v1  ;;  %v1083_v0 = vsub.f32 %v36_v61, %v1053_v62 }
 0x362   :  { %vm657_vm7 = vmor %vm655_vm6, %vm656_vm5 }
 0x363   :  { %v651_v3 = vmul.f32 %v1267_v1, %v650_v2  ;;  %v34_v2 = vld [vmem:[%s1415_s1 + $0xa8] sm:$0xff] }
 0x365   :  { %v652_v4 = vmul.f32 0.5, %v651_v3  ;;  %v1084_v3 = vand.u32 4294901760, %v1083_v0 }
 0x367   :  { %v653_v5 = vsub.f32 1.5, %v652_v4 }
 0x369   :  { %v654_v6 = vmul.f32 %v1267_v1, %v653_v5  ;;  %v1057_v5 = vand.u32 4294901760, %v34_v2 }
 0x36b   :  { %v658_v8 = vsel %vm657_vm7, %v1267_v1, %v654_v6  ;;  %v1055_v1 = vand.u32 4294901760, %v35_v63  ;;  %v33_v6 = vld [vmem:[%s1415_s1 + $0xa0] sm:$0xff] }
 0x36c   :  { %v659_v9 = vmul.f32 %v658_v8, %v1361_v36  ;;  %v908_v36 = vsub.f32 %v906_v28, %v907_v33  ;;  %v1085_v8 = vsub.f32 %v1083_v0, %v1084_v3 }
 0x36d   :  { %v1089_v4 = vsub.f32 %v35_v63, %v1055_v1 }
 0x36e   :  { %v661_v10 = vsel %vm46_vm0, %v659_v9, 0  ;;  %v909_v38 = vand.u32 4294901760, %v908_v36 }
 0x36f   :  { %v683_v11 = vand.u32 4294901760, %v661_v10  ;;  %v1090_v9 = vand.u32 4294901760, %v1089_v4 }
 0x370   :  { %910 = vmatpush.msra.mxu1 %v909_v38 }
 0x371   :  { %729 = vmatmul.f32.vlgmr.msra.gmra.mxu3 %v683_v11  ;;  %v684_v12 = vsub.f32 %v661_v10, %v683_v11  ;;  %v1095_v10 = vsub.f32 %v34_v2, %v1057_v5 }
 0x372   :  { %965 = vmatpush.msra.mxu3 %v864_v17  ;;  %916 = vmatpush.msra.mxu1 %v915_v40 }
 0x373   :  { %759 = vmatmul.f32.vlgmr.msrb.gmra.mxu0 %v684_v12  ;;  %v685_v13 = vand.u32 4294901760, %v684_v12 }
 0x374   :  { %967 = vmatpush.msra.mxu3 %v866_v20  ;;  %994 = vmatpush.msrb.mxu0 %v895_v22  ;;  %v44_v22 = vperm.slane %v1321_v31, 6 }
 0x375   :  { %786 = vmatmul.f32.vlgmr.msrb.gmra.mxu1 %v685_v13  ;;  %v686_v14 = vsub.f32 %v684_v12, %v685_v13  ;;  %v1086_v12 = vand.u32 4294901760, %v1085_v8  ;;  %v1091_v13 = vsub.f32 %v1089_v4, %v1090_v9 }
 0x376   :  { %969 = vmatpush.msra.mxu3 %v868_v24  ;;  %998 = vmatpush.msrb.mxu0 %v901_v27 }
 0x377   :  { %v687_v15 = vand.u32 4294901760, %v686_v14  ;;  %1025 = vmatpush.msrb.mxu1 %v864_v17  ;;  %v1096_v14 = vand.u32 4294901760, %v1095_v10  ;;  %v1092_v16 = vand.u32 4294901760, %v1091_v13 }
 0x378   :  { %971 = vmatpush.msra.mxu3 %v870_v29  ;;  %1002 = vmatpush.msrb.mxu0 %v907_v33 }
 0x379   :  { %688 = vmatmul.f32.vlgmr.msra.gmra.mxu2 %v687_v15  ;;  %844 = vmatmul.f32.vlgmr.msrb.gmra.mxu3 %v683_v11  ;;  %v1097_v17 = vsub.f32 %v1095_v10, %v1096_v14 }
 0x37a   :  { %936 = vmatpush.msra.mxu2 %v894_v19  ;;  %1006 = vmatpush.msrb.mxu0 %v913_v37 }
 0x37b   :  { %1027 = vmatpush.msrb.mxu1 %v866_v20  ;;  %1087 = vmatpush.msrb.mxu3 %v1086_v12  ;;  %v1098_v19 = vand.u32 4294901760, %v1097_v17 }
 0x37c   :  { %939 = vmatpush.msra.mxu2 %v900_v23 }
 0x37d   :  { %1029 = vmatpush.msrb.mxu1 %v868_v24  ;;  %1093 = vmatpush.msrb.mxu3 %v1092_v16 }
 0x37e   :  { %942 = vmatpush.msra.mxu2 %v906_v28 }
 0x37f   :  { %1031 = vmatpush.msrb.mxu1 %v870_v29  ;;  %1099 = vmatpush.msrb.mxu3 %v1098_v19 }
 0x380   :  { %945 = vmatpush.msra.mxu2 %v912_v34 }
 0x381   :  { %819 = vmatmul.f32.vlgmr.msrb.gmra.mxu2 %v683_v11  ;;  %v1059_v11 = vand.u32 4294901760, %v33_v6 }
 0x382   :  { %1054 = vmatpush.msrb.mxu2 %v1053_v62 }
 0x383   :  { %v1101_v15 = vsub.f32 %v33_v6, %v1059_v11 }
 0x384   :  { %1056 = vmatpush.msrb.mxu2 %v1055_v1 }
 0x385   :  { %v1102_v18 = vand.u32 4294901760, %v1101_v15 }
 0x386   :  { %1058 = vmatpush.msrb.mxu2 %v1057_v5 }
 0x387   :  { %v1103_v20 = vsub.f32 %v1101_v15, %v1102_v18 }
 0x388   :  { %1060 = vmatpush.msrb.mxu2 %v1059_v11 }
 0x389   :  { %v1104_v21 = vand.u32 4294901760, %v1103_v20 }
 0x38b   :  { %1105 = vmatpush.msrb.mxu3 %v1104_v21 }
 0x3f0   :  { %v760_v46 = vpop.f32.mrf.mxu0 }
 0x3f2   :  { %v787_v48 = vpop.f32.mrf.mxu1 }
 0x3f4   :  { %v730_v42 = vpop.f32.mrf.mxu3 }
 0x3fc   :  { %v689_v43 = vpop.f32.mrf.mxu2  ;;  %v845_v52 = vpop.f32.mrf.mxu3 }
 0x3fd   :  { %v690_v44 = vadd.f32 %v689_v43, %v43_v41  ;;  %v45_v43 = vperm.slane %v1321_v31, 7 }
 0x3ff   :  { %v731_v45 = vadd.f32 %v730_v42, %v690_v44 }
 0x401   :  { %v761_v47 = vadd.f32 %v760_v46, %v731_v45 }
 0x403   :  { %v788_v49 = vadd.f32 %v787_v48, %v761_v47 }
 0x404   :  { %v820_v50 = vpop.f32.mrf.mxu2 }
 0x405   :  { %v821_v51 = vadd.f32 %v820_v50, %v788_v49 }
 0x407   :  { %v846_v53 = vadd.f32 %v845_v52, %v821_v51 }
 0x409   :  { %v848_v54 = vmax.f32 %v846_v53, 0.0 }
 0x40b   :  { %v850_v55 = vsel %vm46_vm0, %v848_v54, 0 }
 0x40c   :  { %v872_v56 = vand.u32 4294901760, %v850_v55 }
 0x40e   :  { %v873_v57 = vsub.f32 %v850_v55, %v872_v56  ;;  %918 = vmatmul.f32.vlgmr.msra.gmra.mxu1 %v872_v56 }
 0x40f   :  { %1154 = vmatpush.msra.mxu1 %v1053_v62 }
 0x410   :  { %948 = vmatmul.f32.vlgmr.msra.gmra.mxu2 %v873_v57  ;;  %v874_v58 = vand.u32 4294901760, %v873_v57 }
 0x411   :  { %1156 = vmatpush.msra.mxu1 %v1055_v1  ;;  %1183 = vmatpush.msra.mxu2 %v1084_v3 }
 0x412   :  { %975 = vmatmul.f32.vlgmr.msra.gmra.mxu3 %v874_v58  ;;  %v875_v59 = vsub.f32 %v873_v57, %v874_v58 }
 0x413   :  { %1158 = vmatpush.msra.mxu1 %v1057_v5  ;;  %1187 = vmatpush.msra.mxu2 %v1090_v9 }
 0x414   :  { %v876_v60 = vand.u32 4294901760, %v875_v59  ;;  %1214 = vmatpush.msra.mxu3 %v1053_v62 }
 0x415   :  { %1160 = vmatpush.msra.mxu1 %v1059_v11  ;;  %1191 = vmatpush.msra.mxu2 %v1096_v14 }
 0x416   :  { %877 = vmatmul.f32.vlgmr.msra.gmra.mxu0 %v876_v60  ;;  %1033 = vmatmul.f32.vlgmr.msrb.gmra.mxu1 %v872_v56 }
 0x417   :  { %1125 = vmatpush.msra.mxu0 %v1083_v0  ;;  %1195 = vmatpush.msra.mxu2 %v1102_v18 }
 0x418   :  { %1216 = vmatpush.msra.mxu3 %v1055_v1 }
 0x419   :  { %1128 = vmatpush.msra.mxu0 %v1089_v4 }
 0x41a   :  { %1218 = vmatpush.msra.mxu3 %v1057_v5 }
 0x41b   :  { %1131 = vmatpush.msra.mxu0 %v1095_v10 }
 0x41c   :  { %1220 = vmatpush.msra.mxu3 %v1059_v11 }
 0x41d   :  { %1134 = vmatpush.msra.mxu0 %v1101_v15 }
 0x41e   :  { %1008 = vmatmul.f32.vlgmr.msrb.gmra.mxu0 %v872_v56 }
 0x48b   :  { %v919_v23 = vpop.f32.mrf.mxu1 }
 0x493   :  { %v878_v24 = vpop.f32.mrf.mxu0  ;;  %v949_v27 = vpop.f32.mrf.mxu2 }
 0x494   :  { %v879_v25 = vadd.f32 %v878_v24, %v44_v22  ;;  %v1034_v34 = vpop.f32.mrf.mxu1 }
 0x495   :  { %v976_v29 = vpop.f32.mrf.mxu3 }
 0x496   :  { %v920_v26 = vadd.f32 %v919_v23, %v879_v25 }
 0x498   :  { %v950_v28 = vadd.f32 %v949_v27, %v920_v26 }
 0x49a   :  { %v977_v30 = vadd.f32 %v976_v29, %v950_v28 }
 0x49b   :  { %v1009_v32 = vpop.f32.mrf.mxu0 }
 0x49c   :  { %v1010_v33 = vadd.f32 %v1009_v32, %v977_v30 }
 0x49e   :  { %v1035_v35 = vadd.f32 %v1034_v34, %v1010_v33 }
 0x4a0   :  { %v1037_v36 = vmax.f32 %v1035_v35, 0.0 }
 0x4a2   :  { %v1039_v37 = vsel %vm46_vm0, %v1037_v36, 0 }
 0x4a3   :  { %v1061_v38 = vand.u32 4294901760, %v1039_v37 }
 0x4a5   :  { %v1062_v39 = vsub.f32 %v1039_v37, %v1061_v38  ;;  %1107 = vmatmul.f32.vlgmr.msrb.gmra.mxu3 %v1061_v38 }
 0x4a7   :  { %1137 = vmatmul.f32.vlgmr.msra.gmra.mxu0 %v1062_v39  ;;  %v1063_v40 = vand.u32 4294901760, %v1062_v39 }
 0x4a9   :  { %1164 = vmatmul.f32.vlgmr.msra.gmra.mxu1 %v1063_v40  ;;  %v1064_v41 = vsub.f32 %v1062_v39, %v1063_v40 }
 0x4ab   :  { %v1065_v42 = vand.u32 4294901760, %v1064_v41 }
 0x4ad   :  { %1066 = vmatmul.f32.vlgmr.msrb.gmra.mxu2 %v1065_v42  ;;  %1222 = vmatmul.f32.vlgmr.msra.gmra.mxu3 %v1061_v38 }
 0x4b5   :  { %1197 = vmatmul.f32.vlgmr.msra.gmra.mxu2 %v1061_v38 }
 0x524   :  { %v1138_v48 = vpop.f32.mrf.mxu0 }
 0x526   :  { %v1165_v50 = vpop.f32.mrf.mxu1 }
 0x528   :  { %v1108_v44 = vpop.f32.mrf.mxu3 }
 0x530   :  { %v1067_v45 = vpop.f32.mrf.mxu2  ;;  %v1223_v54 = vpop.f32.mrf.mxu3 }
 0x531   :  { %v1068_v46 = vadd.f32 %v1067_v45, %v45_v43 }
 0x533   :  { %v1109_v47 = vadd.f32 %v1108_v44, %v1068_v46 }
 0x535   :  { %v1139_v49 = vadd.f32 %v1138_v48, %v1109_v47 }
 0x537   :  { %v1166_v51 = vadd.f32 %v1165_v50, %v1139_v49 }
 0x538   :  { %v1198_v52 = vpop.f32.mrf.mxu2 }
 0x539   :  { %v1199_v53 = vadd.f32 %v1198_v52, %v1166_v51 }
 0x53b   :  { %v1224_v55 = vadd.f32 %v1223_v54, %v1199_v53 }
 0x53d   :  { %v1226_v56 = vsub.f32 %v1224_v55, %v1314_v7 }
 0x53f   :  { %v1227_v57 = vmul.f32 %v1226_v56, %v1226_v56 }
 0x541   :  { %v1228_v58 = vsel %vm46_vm0, %v1227_v57, 0.0 }
 0x542   :  { %1229 = vadd.xlane.f32.xlu1 %v1228_v58 }
 0x5b5   :  { %v1230_v59 = vpop.xlane.xlu1 %1229 }
 0x5b6   :  { %v1231_v31 = vrot.slane %v1230_v59, 4 }
 0x5b8   :  { %v1232_v60 = vadd.f32 %v1231_v31, %v1230_v59 }
 0x5ba   :  { %v1233_v61 = vrot.slane %v1232_v60, 2 }
 0x5bc   :  { %v1234_v62 = vadd.f32 %v1233_v61, %v1232_v60 }
 0x5be   :  { %v1235_v63 = vrot.slane %v1234_v62, 1 }
 0x5c0   :  { %v1236_v0 = vadd.f32 %v1235_v63, %v1234_v62 }
 0x5c2   :  { %1256 = vpush %v1236_v0 }
 0x5f3   :  { %s1257_s5 = spop %1256 }
 0x5f4   :  { %s1238_s6 = smul.f32 0.0078125, %s1257_s5 }
 0x5f6   :  { %1240 = sst [smem:[#allocation2]] %s1238_s6 }
 0x5f7   :  { %1249 = dma.smem_to_hbm %s1283_s7, 16, %s1247_s4, [#allocation3]  }
 0x5f8   :  { %1280 = dma.done.wait [#allocation3], 16  }
 0x5f9   :  { %1281 = vsyncadd [#allocation3], 4294967280 }
 0x5fa   :  { %1254 = sfence }
 0x5fb   :  { %1255 = vsyncpa [#allocation3], 1 }

</bundles_post_ra>
